<compile_context>
chip_gen: v7x
topology: tpu7x:2x2x1
jax: 0.10.0
libtpu: 0.0.40
codegen_flags: <defaults>
</compile_context>

<pallas_src>
import jax
import jax.numpy as jnp
from jax.experimental import pallas as pl
from jax.experimental.pallas import tpu as pltpu

OBS = 25
ACT = 6
IN_DIM = OBS + ACT            # 31
K_PAD = IN_DIM + 1            # 32: ones column carries b1
HIDDEN = 500
HIDDEN_HALF_PAD = 512         # each head's hidden padded 500 -> 512
HIDDEN_PAD = 2 * HIDDEN_HALF_PAD   # 1024 (actor hidden | critic hidden)
ACTOR_OUT = ACT * 2           # 12
CRITIC_OUT = 1
OUT_PAD = 128                 # lane-dense fused output width (>= 12 + 1)

N_CHUNKS = 4
CHUNK = HIDDEN_PAD // N_CHUNKS     # 256-wide hidden chunks

DEFAULT_TILE_B = 1024         # batch tile (sweepable); weights stay resident


def _round_up(n, m):
    return ((n + m - 1) // m) * m


def _mlp_kernel(x_ref, w1_ref, w2_ref, b2_ref, out_ref):
    # x_ref : (TILE_B, 32)   bf16   (last column = 1.0, folds b1)
    # w1_ref: (32, 1024)     bf16   (row 31 = b1; cols 0:512 actor, 512:1024 critic)
    # w2_ref: (1024, 128)    bf16   (block-diagonal actor/critic output heads)
    # b2_ref: (1, 128)       f32
    # out_ref: (TILE_B, 128) f32
    x = x_ref[...]
    acc = jnp.zeros(out_ref.shape, jnp.float32)

    # Static chunking over the hidden dim: keeps each h chunk in vregs,
    # lets the EUP tanh of chunk c overlap MXU pushes of neighboring chunks.
    for c in range(N_CHUNKS):
        lo = c * CHUNK
        hi = lo + CHUNK
        pre = jnp.dot(x, w1_ref[:, lo:hi],
                      preferred_element_type=jnp.float32)       # (TILE_B, 256) f32
        h = jnp.tanh(pre)                                        # f32 tanh (v5e-safe EUP path)
        acc = acc + jnp.dot(h.astype(jnp.bfloat16), w2_ref[lo:hi, :],
                            preferred_element_type=jnp.float32)  # (TILE_B, 128) f32

    out_ref[...] = acc + b2_ref[...]


def pack_params(p):
    """Fuse per-layer params into the concatenated / padded / bf16 kernel layout."""
    # First layer: actor hidden in cols 0:512 (500 real), critic in 512:1024.
    # Row 31 carries the biases (wrapper appends a ones column to x).
    w1 = jnp.zeros((K_PAD, HIDDEN_PAD), jnp.float32)
    w1 = w1.at[:IN_DIM, :HIDDEN].set(p["wa1"])
    w1 = w1.at[:IN_DIM, HIDDEN_HALF_PAD:HIDDEN_HALF_PAD + HIDDEN].set(p["wc1"])
    w1 = w1.at[IN_DIM, :HIDDEN].set(p["ba1"][0])
    w1 = w1.at[IN_DIM, HIDDEN_HALF_PAD:HIDDEN_HALF_PAD + HIDDEN].set(p["bc1"][0])

    # Second layer: block-diagonal, lane-dense 128-wide fused output.
    #   rows   0:500 , cols  0:12 -> actor head
    #   rows 512:1012, col     12 -> critic head       (padded rows/cols zero)
    w2 = jnp.zeros((HIDDEN_PAD, OUT_PAD), jnp.float32)
    w2 = w2.at[:HIDDEN, :ACTOR_OUT].set(p["wa2"])
    w2 = w2.at[HIDDEN_HALF_PAD:HIDDEN_HALF_PAD + HIDDEN,
               ACTOR_OUT:ACTOR_OUT + CRITIC_OUT].set(p["wc2"])

    b2 = jnp.zeros((1, OUT_PAD), jnp.float32)
    b2 = b2.at[:, :ACTOR_OUT].set(p["ba2"])
    b2 = b2.at[:, ACTOR_OUT:ACTOR_OUT + CRITIC_OUT].set(p["bc2"])

    return dict(w1=w1.astype(jnp.bfloat16),
                w2=w2.astype(jnp.bfloat16),
                b2=b2)


def mlp_forward(x, packed, *, tile_b=DEFAULT_TILE_B):
    """x: (B, 31) float32. packed: output of pack_params. Returns (actor, critic)."""
    B = x.shape[0]

    # Fold b1: append a ones column; cast to bf16 for the MXU.
    x_aug = jnp.concatenate([x, jnp.ones((B, 1), x.dtype)], axis=1)
    x_aug = x_aug.astype(jnp.bfloat16)                       # (B, 32)

    # Adaptive batch tiling: near-equal tiles <= tile_b, multiples of 16
    # (bf16 sublane packing).  Avoids up-to-2x padding waste on ragged B.
    n_tiles = max(1, -(-B // tile_b))
    tile_b = _round_up(-(-B // n_tiles), 16)
    b_pad = tile_b * n_tiles
    if b_pad != B:
        x_aug = jnp.pad(x_aug, ((0, b_pad - B), (0, 0)))

    out = pl.pallas_call(
        _mlp_kernel,
        out_shape=jax.ShapeDtypeStruct((b_pad, OUT_PAD), jnp.float32),
        grid_spec=pltpu.PrefetchScalarGridSpec(
            num_scalar_prefetch=0,
            grid=(n_tiles,),
            in_specs=[
                # streamed per batch tile
                pl.BlockSpec((tile_b, K_PAD), lambda i: (i, 0)),
                # weights / bias: constant index_map -> fetched once, VMEM-resident
                pl.BlockSpec((K_PAD, HIDDEN_PAD), lambda i: (0, 0)),
                pl.BlockSpec((HIDDEN_PAD, OUT_PAD), lambda i: (0, 0)),
                pl.BlockSpec((1, OUT_PAD), lambda i: (0, 0)),
            ],
            out_specs=pl.BlockSpec((tile_b, OUT_PAD), lambda i: (i, 0)),
        ),
        compiler_params=pltpu.CompilerParams(
            dimension_semantics=(pltpu.PARALLEL,),
        ),
    )(x_aug, packed["w1"], packed["w2"], packed["b2"])

    out = out[:B]
    actor = out[:, :ACTOR_OUT]
    critic = out[:, ACTOR_OUT:ACTOR_OUT + CRITIC_OUT]        # keep (B, 1) shape
    return actor, critic


def init_params(key):
    """Deterministic init mimicking PyTorch Linear default: U(-1/sqrt(fan_in), 1/sqrt(fan_in))."""
    keys = jax.random.split(key, 8)

    def linear(kw, kb, fan_in, fan_out):
        bound = 1.0 / jnp.sqrt(jnp.float32(fan_in))
        w = jax.random.uniform(kw, (fan_in, fan_out), jnp.float32, -bound, bound)
        b = jax.random.uniform(kb, (1, fan_out), jnp.float32, -bound, bound)
        return w, b

    wa1, ba1 = linear(keys[0], keys[1], IN_DIM, HIDDEN)
    wa2, ba2 = linear(keys[2], keys[3], HIDDEN, ACTOR_OUT)
    wc1, bc1 = linear(keys[4], keys[5], IN_DIM, HIDDEN)
    wc2, bc2 = linear(keys[6], keys[7], HIDDEN, CRITIC_OUT)
    return dict(wa1=wa1, ba1=ba1, wa2=wa2, ba2=ba2,
                wc1=wc1, bc1=bc1, wc2=wc2, bc2=bc2)


def mlp_ref(x, p):
    """Pure-JAX f32 reference for correctness check (matches PyTorch module)."""
    ha = jnp.tanh(x @ p["wa1"] + p["ba1"])
    actor = ha @ p["wa2"] + p["ba2"]
    hc = jnp.tanh(x @ p["wc1"] + p["bc1"])
    critic = hc @ p["wc2"] + p["bc2"]
    return actor, critic


if __name__ == "__main__":
    key = jax.random.PRNGKey(0)
    k_x, k_p = jax.random.split(key)

    B = 8
    x = jax.random.normal(k_x, (B, IN_DIM), jnp.float32)
    params = init_params(k_p)
    packed = pack_params(params)

    actor_out, critic_out = mlp_forward(x, packed)
    jax.block_until_ready((actor_out, critic_out))

    # Correctness check against the f32 reference.  Kernel uses bf16 MXU
    # operands with f32 accumulation, so tolerance is relaxed accordingly.
    actor_ref_out, critic_ref_out = mlp_ref(x, params)
    assert actor_out.shape == (B, ACTOR_OUT)
    assert critic_out.shape == (B, CRITIC_OUT)
    assert jnp.allclose(actor_out, actor_ref_out, atol=5e-2, rtol=5e-2)
    assert jnp.allclose(critic_out, critic_ref_out, atol=5e-2, rtol=5e-2)

    print("KERNEL_OK")
</pallas_src>

<mosaic_0001>
module attributes {stable_mosaic.version = 11 : i64} {
  func.func @_mlp_kernel(%arg0: i32, %arg1: memref<16x32xbf16, #tpu.memory_space<vmem>>, %arg2: memref<32x1024xbf16, #tpu.memory_space<vmem>>, %arg3: memref<1024x128xbf16, #tpu.memory_space<vmem>>, %arg4: memref<1x128xf32, #tpu.memory_space<vmem>>, %arg5: memref<16x128xf32, #tpu.memory_space<vmem>>) attributes {dimension_semantics = [#tpu.dimension_semantics<parallel>], iteration_bounds = array<i64: 1>, scalar_prefetch = 0 : i64, scratch_operands = 0 : i64, tpu.core_type = #tpu.core_type<tc>, window_params = [{transform_indices = @transform_0, window_bounds = array<i64: 16, 32>}, {pipeline_mode = #tpu.pipeline_mode<synchronous>, transform_indices = @transform_1, window_bounds = array<i64: 32, 1024>}, {pipeline_mode = #tpu.pipeline_mode<synchronous>, transform_indices = @transform_2, window_bounds = array<i64: 1024, 128>}, {pipeline_mode = #tpu.pipeline_mode<synchronous>, transform_indices = @transform_3, window_bounds = array<i64: 1, 128>}, {transform_indices = @transform_4, window_bounds = array<i64: 16, 128>}]} {
    %c0 = arith.constant 0 : index
    %c0_0 = arith.constant 0 : index
    %0 = vector.load %arg1[%c0, %c0_0] : memref<16x32xbf16, #tpu.memory_space<vmem>>, vector<16x32xbf16>
    %cst = arith.constant 0.000000e+00 : f32
    %1 = vector.broadcast %cst : f32 to vector<16x128xf32>
    %c0_1 = arith.constant 0 : index
    %c0_2 = arith.constant 0 : index
    %2 = vector.load %arg2[%c0_1, %c0_2] : memref<32x1024xbf16, #tpu.memory_space<vmem>>, vector<32x256xbf16>
    %cst_3 = arith.constant dense<0.000000e+00> : vector<16x256xf32>
    %3 = tpu.matmul %0, %2, %cst_3 {dimension_numbers = #tpu.dot_dimension_numbers<[1], [0], [0], [1], [0, 0, 1, 1], [], []>} : vector<16x32xbf16>, vector<32x256xbf16>, vector<16x256xf32> -> vector<16x256xf32>
    %4 = math.tanh %3 : vector<16x256xf32>
    %5 = arith.truncf %4 : vector<16x256xf32> to vector<16x256xbf16>
    %c0_4 = arith.constant 0 : index
    %c0_5 = arith.constant 0 : index
    %6 = vector.load %arg3[%c0_4, %c0_5] : memref<1024x128xbf16, #tpu.memory_space<vmem>>, vector<256x128xbf16>
    %cst_6 = arith.constant dense<0.000000e+00> : vector<16x128xf32>
    %7 = tpu.matmul %5, %6, %cst_6 {dimension_numbers = #tpu.dot_dimension_numbers<[1], [0], [0], [1], [0, 0, 1, 1], [], []>} : vector<16x256xbf16>, vector<256x128xbf16>, vector<16x128xf32> -> vector<16x128xf32>
    %8 = arith.addf %1, %7 : vector<16x128xf32>
    %c0_7 = arith.constant 0 : index
    %c256 = arith.constant 256 : index
    %9 = vector.load %arg2[%c0_7, %c256] : memref<32x1024xbf16, #tpu.memory_space<vmem>>, vector<32x256xbf16>
    %cst_8 = arith.constant dense<0.000000e+00> : vector<16x256xf32>
    %10 = tpu.matmul %0, %9, %cst_8 {dimension_numbers = #tpu.dot_dimension_numbers<[1], [0], [0], [1], [0, 0, 1, 1], [], []>} : vector<16x32xbf16>, vector<32x256xbf16>, vector<16x256xf32> -> vector<16x256xf32>
    %11 = math.tanh %10 : vector<16x256xf32>
    %12 = arith.truncf %11 : vector<16x256xf32> to vector<16x256xbf16>
    %c256_9 = arith.constant 256 : index
    %c0_10 = arith.constant 0 : index
    %13 = vector.load %arg3[%c256_9, %c0_10] : memref<1024x128xbf16, #tpu.memory_space<vmem>>, vector<256x128xbf16>
    %cst_11 = arith.constant dense<0.000000e+00> : vector<16x128xf32>
    %14 = tpu.matmul %12, %13, %cst_11 {dimension_numbers = #tpu.dot_dimension_numbers<[1], [0], [0], [1], [0, 0, 1, 1], [], []>} : vector<16x256xbf16>, vector<256x128xbf16>, vector<16x128xf32> -> vector<16x128xf32>
    %15 = arith.addf %8, %14 : vector<16x128xf32>
    %c0_12 = arith.constant 0 : index
    %c512 = arith.constant 512 : index
    %16 = vector.load %arg2[%c0_12, %c512] : memref<32x1024xbf16, #tpu.memory_space<vmem>>, vector<32x256xbf16>
    %cst_13 = arith.constant dense<0.000000e+00> : vector<16x256xf32>
    %17 = tpu.matmul %0, %16, %cst_13 {dimension_numbers = #tpu.dot_dimension_numbers<[1], [0], [0], [1], [0, 0, 1, 1], [], []>} : vector<16x32xbf16>, vector<32x256xbf16>, vector<16x256xf32> -> vector<16x256xf32>
    %18 = math.tanh %17 : vector<16x256xf32>
    %19 = arith.truncf %18 : vector<16x256xf32> to vector<16x256xbf16>
    %c512_14 = arith.constant 512 : index
    %c0_15 = arith.constant 0 : index
    %20 = vector.load %arg3[%c512_14, %c0_15] : memref<1024x128xbf16, #tpu.memory_space<vmem>>, vector<256x128xbf16>
    %cst_16 = arith.constant dense<0.000000e+00> : vector<16x128xf32>
    %21 = tpu.matmul %19, %20, %cst_16 {dimension_numbers = #tpu.dot_dimension_numbers<[1], [0], [0], [1], [0, 0, 1, 1], [], []>} : vector<16x256xbf16>, vector<256x128xbf16>, vector<16x128xf32> -> vector<16x128xf32>
    %22 = arith.addf %15, %21 : vector<16x128xf32>
    %c0_17 = arith.constant 0 : index
    %c768 = arith.constant 768 : index
    %23 = vector.load %arg2[%c0_17, %c768] : memref<32x1024xbf16, #tpu.memory_space<vmem>>, vector<32x256xbf16>
    %cst_18 = arith.constant dense<0.000000e+00> : vector<16x256xf32>
    %24 = tpu.matmul %0, %23, %cst_18 {dimension_numbers = #tpu.dot_dimension_numbers<[1], [0], [0], [1], [0, 0, 1, 1], [], []>} : vector<16x32xbf16>, vector<32x256xbf16>, vector<16x256xf32> -> vector<16x256xf32>
    %25 = math.tanh %24 : vector<16x256xf32>
    %26 = arith.truncf %25 : vector<16x256xf32> to vector<16x256xbf16>
    %c768_19 = arith.constant 768 : index
    %c0_20 = arith.constant 0 : index
    %27 = vector.load %arg3[%c768_19, %c0_20] : memref<1024x128xbf16, #tpu.memory_space<vmem>>, vector<256x128xbf16>
    %cst_21 = arith.constant dense<0.000000e+00> : vector<16x128xf32>
    %28 = tpu.matmul %26, %27, %cst_21 {dimension_numbers = #tpu.dot_dimension_numbers<[1], [0], [0], [1], [0, 0, 1, 1], [], []>} : vector<16x256xbf16>, vector<256x128xbf16>, vector<16x128xf32> -> vector<16x128xf32>
    %29 = arith.addf %22, %28 : vector<16x128xf32>
    %c0_22 = arith.constant 0 : index
    %c0_23 = arith.constant 0 : index
    %30 = vector.load %arg4[%c0_22, %c0_23] : memref<1x128xf32, #tpu.memory_space<vmem>>, vector<1x128xf32>
    %31 = vector.broadcast %30 : vector<1x128xf32> to vector<16x128xf32>
    %32 = arith.addf %29, %31 : vector<16x128xf32>
    %c0_24 = arith.constant 0 : index
    %c0_25 = arith.constant 0 : index
    %33 = vector.load %arg5[%c0_24, %c0_25] : memref<16x128xf32, #tpu.memory_space<vmem>>, vector<16x128xf32>
    tpu.vector_store %arg5[%c0_24, %c0_25], %32 {strides = array<i32>} : memref<16x128xf32, #tpu.memory_space<vmem>>, vector<16x128xf32>,
    return
  }
  func.func @transform_0(%arg0: i32) -> (i32, i32) {
    %c0_i32 = arith.constant 0 : i32
    %c0_i32_0 = arith.constant 0 : i32
    return %arg0, %c0_i32 : i32, i32
  }
  func.func @transform_1(%arg0: i32) -> (i32, i32) {
    %c0_i32 = arith.constant 0 : i32
    %c0_i32_0 = arith.constant 0 : i32
    %c0_i32_1 = arith.constant 0 : i32
    return %c0_i32, %c0_i32_0 : i32, i32
  }
  func.func @transform_2(%arg0: i32) -> (i32, i32) {
    %c0_i32 = arith.constant 0 : i32
    %c0_i32_0 = arith.constant 0 : i32
    %c0_i32_1 = arith.constant 0 : i32
    return %c0_i32, %c0_i32_0 : i32, i32
  }
  func.func @transform_3(%arg0: i32) -> (i32, i32) {
    %c0_i32 = arith.constant 0 : i32
    %c0_i32_0 = arith.constant 0 : i32
    %c0_i32_1 = arith.constant 0 : i32
    return %c0_i32, %c0_i32_0 : i32, i32
  }
  func.func @transform_4(%arg0: i32) -> (i32, i32) {
    %c0_i32 = arith.constant 0 : i32
    %c0_i32_0 = arith.constant 0 : i32
    return %arg0, %c0_i32 : i32, i32
  }
}

</mosaic_0001>

<bundles_post_ra>
// kernel: tpu_custom_call.1
= control target key start
LH: loop header
LB: loop body
LE: loop exit
PB: predicated region body
PF: predicated region fallthrough
CT: control target
= control target key end

     0   :  { %9 = vsyncpa [#allocation3], 0  ;;  %s1549_s0 = inlined_call_operand.hbm [shape: bf16[16,32], index: 0, kind: input, shape index: {}]   ;;  %s1550_s1 = inlined_call_operand.hbm [shape: bf16[32,1024], index: 1, kind: input, shape index: {}]   ;;  %s1551_s2 = inlined_call_operand.hbm [shape: bf16[1024,128], index: 2, kind: input, shape index: {}]   ;;  %s1552_s3 = inlined_call_operand.vmem [shape: f32[1,128], index: 3, kind: input, shape index: {}]   ;;  %s1553_s4 = inlined_call_operand.hbm [shape: f32[16,128], index: 4, kind: output, shape index: {}]  }
   0x1   :  { %10 = vsyncpa [#allocation6], 0 }
   0x2   :  { %11 = vsyncpa [#allocation4], 0  ;;  %s1448_s15 = smov [#allocation5]   ;;  %s1354_s19 = scalar_lea.hbm %s1550_s1, 2048 }
   0x3   :  { %s29_s16 = sshll.u32 %s1448_s15, 4  ;;  %p1355_p0 = scmp.ne.s32.totalorder %s1550_s1, %s1354_s19  ;;  %s30_s16 = int_to_ptr.vmem [resolvable:$true] %s29_s16 }
   0x4   :  { %p1358_p1 = scmp.lt.u32.totalorder %s1354_s19, %s1550_s1 }
   0x6   :  { %p1360_p2 = pnand %p1358_p1, %p1355_p0 }
   0x8   :  { %1363 = shalt.err (!%p1360_p2)
}
   0x9   :  { %s1364_s24 = scalar_lea.vmem %s30_s16, 2048  ;;  %p1369_p4 = scmp.lt.s32.totalorder %s30_s16, %s30_s16 }
   0xa   :  { %p1365_p3 = scmp.ne.s32.totalorder %s30_s16, %s1364_s24  ;;  %p1370_p5 = scmp.lt.s32.totalorder %s1364_s24, %s1364_s24 }
   0xc   :  { %p1371_p6 = por %p1370_p5, %p1369_p4 }
   0xe   :  { %p1372_p7 = pnand %p1371_p6, %p1365_p3 }
  0x10   :  { %1375 = shalt.err (!%p1372_p7)
}
  0x11   :  { %s1449_s25 = smov 512   ;;  %s1450_s26 = smov 32  }
  0x12   :  { %35 = dma.hbm_to_vmem [thread:$0]  %s1550_s1, 2048, %s30_s16, [#allocation6], %s1449_s25, %s1449_s25, %s1450_s26  }
  0x13   :  { %s1451_s29 = smov [#allocation2]   ;;  %s1376_s7 = scalar_lea.hbm %s1549_s0, 128 }
  0x14   :  { %s17_s30 = sshll.u32 %s1451_s29, 4  ;;  %p1377_p8 = scmp.ne.s32.totalorder %s1549_s0, %s1376_s7  ;;  %s18_s30 = int_to_ptr.vmem [resolvable:$true] %s17_s30 }
  0x15   :  { %p1380_p9 = scmp.lt.u32.totalorder %s1376_s7, %s1549_s0 }
  0x17   :  { %p1382_p10 = pnand %p1380_p9, %p1377_p8 }
  0x19   :  { %1385 = shalt.err (!%p1382_p10)
}
  0x1a   :  { %s1386_s12 = scalar_lea.vmem %s18_s30, 128  ;;  %p1391_p12 = scmp.lt.s32.totalorder %s18_s30, %s18_s30 }
  0x1b   :  { %p1387_p11 = scmp.ne.s32.totalorder %s18_s30, %s1386_s12  ;;  %p1392_p13 = scmp.lt.s32.totalorder %s1386_s12, %s1386_s12 }
  0x1d   :  { %p1393_p0 = por %p1392_p13, %p1391_p12 }
  0x1f   :  { %p1394_p1 = pnand %p1393_p0, %p1387_p11 }
  0x21   :  { %1397 = shalt.err (!%p1394_p1)
}
  0x22   :  { %s1452_s1 = smov 64   ;;  %s1453_s13 = smov 4  }
  0x23   :  { %23 = dma.hbm_to_vmem [thread:$0]  %s1549_s0, 128, %s18_s30, [#allocation3], %s1452_s1, %s1452_s1, %s1453_s13  }
  0x24   :  { %s1454_s16 = smov [#allocation7]   ;;  %s1398_s20 = scalar_lea.hbm %s1551_s2, 8192 }
  0x25   :  { %s41_s17 = sshll.u32 %s1454_s16, 4  ;;  %p1399_p2 = scmp.ne.s32.totalorder %s1551_s2, %s1398_s20  ;;  %s42_s17 = int_to_ptr.vmem [resolvable:$true] %s41_s17 }
  0x26   :  { %p1402_p3 = scmp.lt.u32.totalorder %s1398_s20, %s1551_s2 }
  0x28   :  { %p1404_p4 = pnand %p1402_p3, %p1399_p2 }
  0x2a   :  { %1407 = shalt.err (!%p1404_p4)
}
  0x2b   :  { %s1408_s25 = scalar_lea.vmem %s42_s17, 8192  ;;  %p1413_p6 = scmp.lt.s32.totalorder %s42_s17, %s42_s17 }
  0x2c   :  { %p1409_p5 = scmp.ne.s32.totalorder %s42_s17, %s1408_s25  ;;  %p1414_p7 = scmp.lt.s32.totalorder %s1408_s25, %s1408_s25 }
  0x2e   :  { %p1415_p8 = por %p1414_p7, %p1413_p6 }
  0x30   :  { %p1416_p9 = pnand %p1415_p8, %p1409_p5 }
  0x32   :  { %1419 = shalt.err (!%p1416_p9)
}
  0x33   :  { %47 = dma.hbm_to_vmem [thread:$0]  %s1551_s2, 8192, %s42_s17, [#allocation6], %s1452_s1, %s1452_s1, %s1453_s13  }
  0x34   :  { %1442 = dma.done.wait [#allocation3], 128  }
  0x35   :  { %1443 = vsyncadd [#allocation3], 4294967168 }
  0x36   :  { %1444 = dma.done.wait [#allocation6], 10240  }
  0x37   :  { %1445 = vsyncadd [#allocation6], 4294957056  ;;  %v1455_v0 = vmov 0   ;;  %v62_v1 = vld [vmem:[#allocation5] sm:$0xff]  ;;  %v176_v8 = vld [vmem:[#allocation5 + $0x8] sm:$0xff]  ;;  %vm91_vm0 = vcmask 261120  }
  0x38   :  { %127 = vmatprep.mubr.bf16.mxu1 %v1455_v0  ;;  %v63_v2 = vld [vmem:[#allocation5 + $0x20] sm:$0xff]  ;;  %v177_v9 = vld [vmem:[#allocation5 + $0x28] sm:$0xff]  ;;  %v1521_v14 = vld [vmem:[#allocation2] sm:$0xff]   ;;  %s1456_s28 = smov [#allocation8]  }
  0x39   :  { %v64_v3 = vld [vmem:[#allocation5 + $0x40] sm:$0xff]  ;;  %v1074_v4 = vcombine.high %v62_v1, %v63_v2  ;;  %v1073_v5 = vcombine.low %v62_v1, %v63_v2  ;;  %v1079_v11 = vcombine.high %v176_v8, %v177_v9  ;;  %v178_v12 = vld [vmem:[#allocation5 + $0x48] sm:$0xff]  ;;  %v1078_v15 = vcombine.low %v176_v8, %v177_v9  ;;  %v1263_v26 = vld [vmem:[#allocation7 + $0x50] sm:$0xff]   ;;  %s1059_s29 = sshll.u32 %s1456_s28, 4  ;;  %s1060_s29 = int_to_ptr.vmem [resolvable:$true] %s1059_s29 }
  0x3a   :  { %v65_v6 = vld [vmem:[#allocation5 + $0x60] sm:$0xff]  ;;  %v179_v13 = vld [vmem:[#allocation5 + $0x68] sm:$0xff]  ;;  %v1265_v27 = vld [vmem:[#allocation7 + $0x10] sm:$0xff]   ;;  %s1420_s30 = scalar_lea.vmem %s1060_s29, 256  ;;  %p1425_p11 = scmp.lt.s32.totalorder %s1060_s29, %s1060_s29 }
  0x3b   :  { %v1076_v7 = vcombine.high %v64_v3, %v65_v6  ;;  %95 = vmatprep.subr.bf16.mxu1 %v1074_v4  ;;  %v1075_v10 = vcombine.low %v64_v3, %v65_v6  ;;  %v1262_v16 = vld [vmem:[#allocation7 + $0xc0] sm:$0xff]   ;;  %v1081_v17 = vcombine.high %v178_v12, %v179_v13  ;;  %v1080_v19 = vcombine.low %v178_v12, %v179_v13  ;;  %v1266_v20 = vld [vmem:[#allocation7 + $0xc8] sm:$0xff]   ;;  %v1267_v28 = vld [vmem:[#allocation7 + $0x58] sm:$0xff]   ;;  %p1421_p10 = scmp.ne.s32.totalorder %s1060_s29, %s1420_s30  ;;  %p1426_p12 = scmp.lt.s32.totalorder %s1420_s30, %s1420_s30 }
  0x3c   :  { %96 = vmatpush1.bf16.msra.mxu1 %v1073_v5  ;;  %1158 = vmatprep.subr.bf16.mxu0 %v1262_v16  ;;  %v1264_v18 = vld [vmem:[#allocation7 + $0x80] sm:$0xff]   ;;  %v1268_v23 = vld [vmem:[#allocation7 + $0x88] sm:$0xff]   ;;  %v1269_v29 = vld [vmem:[#allocation7 + $0x18] sm:$0xff]  }
  0x3d   :  { %97 = vmatprep.subr.bf16.mxu1 %v1076_v7  ;;  %v1258_v21 = vld [vmem:[#allocation7 + $0x40] sm:$0xff]   ;;  %1159 = vmatpush3.bf16.msra.mxu0 %v1264_v18  ;;  %v1260_v24 = vld [vmem:[#allocation7 + $0x48] sm:$0xff]   ;;  %v1270_v30 = vld [vmem:[#allocation7 + $0xd0] sm:$0xff]   ;;  %p1427_p13 = por %p1426_p12, %p1425_p11 }
  0x3e   :  { %v1259_v22 = vld [vmem:[#allocation7] sm:$0xff]   ;;  %1160 = vmatprep.subr.bf16.mxu0 %v1266_v20  ;;  %v1261_v25 = vld [vmem:[#allocation7 + $0x8] sm:$0xff]   ;;  %v1272_v32 = vld [vmem:[#allocation7 + $0x90] sm:$0xff]  }
  0x3f   :  { %v1271_v31 = vld [vmem:[#allocation7 + $0x60] sm:$0xff]   ;;  %v1274_v34 = vld [vmem:[#allocation7 + $0xd8] sm:$0xff]   ;;  %v1275_v35 = vld [vmem:[#allocation7 + $0x68] sm:$0xff]   ;;  %p1428_p0 = pnand %p1427_p13, %p1421_p10 }
  0x40   :  { %98 = vmatpush1.bf16.msra.mxu1 %v1075_v10  ;;  %v1273_v33 = vld [vmem:[#allocation7 + $0x20] sm:$0xff]   ;;  %v1276_v36 = vld [vmem:[#allocation7 + $0x98] sm:$0xff]   ;;  %v1277_v37 = vld [vmem:[#allocation7 + $0x28] sm:$0xff]  }
  0x41   :  { %200 = vmatprep.subr.bf16.mxu1 %v1079_v11  ;;  %1161 = vmatpush3.bf16.msra.mxu0 %v1268_v23  ;;  %v1278_v38 = vld [vmem:[#allocation7 + $0xe0] sm:$0xff]   ;;  %v1279_v39 = vld [vmem:[#allocation7 + $0x70] sm:$0xff]   ;;  %v1282_v42 = vld [vmem:[#allocation7 + $0xe8] sm:$0xff]  }
  0x42   :  { %1162 = vmatprep.subr.bf16.mxu0 %v1270_v30  ;;  %v1280_v40 = vld [vmem:[#allocation7 + $0xa0] sm:$0xff]   ;;  %v1281_v41 = vld [vmem:[#allocation7 + $0x30] sm:$0xff]   ;;  %v1283_v43 = vld [vmem:[#allocation7 + $0x78] sm:$0xff]  }
  0x43   :  { %1077 = vmatmul.mubr.msk.bf16.vlgmr.msra.gmra.mrb[0].mxu1 %vm91_vm0, %v1521_v14  ;;  %v1284_v44 = vld [vmem:[#allocation7 + $0xa8] sm:$0xff]   ;;  %v1285_v45 = vld [vmem:[#allocation7 + $0x38] sm:$0xff]   ;;  %v1286_v46 = vld [vmem:[#allocation7 + $0xf0] sm:$0xff]  }
  0x44   :  { %201 = vmatpush1.bf16.msra.mxu1 %v1078_v15  ;;  %232 = vmatprep.mubr.bf16.mxu1 %v1455_v0  ;;  %v1287_v47 = vld [vmem:[#allocation7 + $0xb0] sm:$0xff]   ;;  %v1288_v48 = vld [vmem:[#allocation7 + $0xf8] sm:$0xff]  }
  0x45   :  { %202 = vmatprep.subr.bf16.mxu1 %v1081_v17  ;;  %1163 = vmatpush3.bf16.msra.mxu0 %v1272_v32  ;;  %v1289_v49 = vld [vmem:[#allocation7 + $0xb8] sm:$0xff]   ;;  %v555_v50 = vld [vmem:[#allocation5 + $0x10] sm:$0xff]  ;;  %v1299_v32 = vld [vmem:[#allocation7 + $0x1c8] sm:$0xff]  }
  0x46   :  { %1164 = vmatprep.subr.bf16.mxu0 %v1274_v34  ;;  %v556_v51 = vld [vmem:[#allocation5 + $0x30] sm:$0xff]  ;;  %v799_v15 = vld [vmem:[#allocation5 + $0x18] sm:$0xff]  ;;  %v1302_v34 = vld [vmem:[#allocation7 + $0x160] sm:$0xff]  }
  0x47   :  { %v1116_v52 = vcombine.high %v555_v50, %v556_v51  ;;  %v1115_v53 = vcombine.low %v555_v50, %v556_v51  ;;  %v557_v8 = vld [vmem:[#allocation5 + $0x50] sm:$0xff]  ;;  %v800_v16 = vld [vmem:[#allocation5 + $0x38] sm:$0xff] }
  0x48   :  { %203 = vmatpush1.bf16.msra.mxu1 %v1080_v19  ;;  %v558_v9 = vld [vmem:[#allocation5 + $0x70] sm:$0xff]  ;;  %v1137_v18 = vcombine.high %v799_v15, %v800_v16  ;;  %v801_v19 = vld [vmem:[#allocation5 + $0x58] sm:$0xff] }
  0x49   :  { %1180 = vmatprep.subr.bf16.mxu1 %v1258_v21  ;;  %1165 = vmatpush3.bf16.msra.mxu0 %v1276_v36  ;;  %v1118_v13 = vcombine.high %v557_v8, %v558_v9  ;;  %v1117_v17 = vcombine.low %v557_v8, %v558_v9  ;;  %v802_v20 = vld [vmem:[#allocation5 + $0x78] sm:$0xff]  ;;  %v1136_v21 = vcombine.low %v799_v15, %v800_v16  ;;  %v1296_v30 = vld [vmem:[#allocation7 + $0x110] sm:$0xff]   ;;  %v1304_v36 = vld [vmem:[#allocation7 + $0x120] sm:$0xff]  }
  0x4a   :  { %1166 = vmatprep.subr.bf16.mxu0 %v1278_v38  ;;  %v1138_v23 = vcombine.low %v801_v19, %v802_v20  ;;  %v1306_v38 = vld [vmem:[#allocation7 + $0x168] sm:$0xff]   ;;  %v1318_v50 = vld [vmem:[#allocation7 + $0x1f0] sm:$0xff]  }
  0x4b   :  { %1082 = vmatmul.mubr.msk.bf16.vlgmr.msra.gmra.mrb[4].mxu1 %vm91_vm0, %v1521_v14  ;;  %v1319_v51 = vld [vmem:[#allocation7 + $0x1b0] sm:$0xff]  }
  0x4c   :  { %1181 = vmatpush3.bf16.msra.mxu1 %v1259_v22  ;;  %v1139_v22 = vcombine.high %v801_v19, %v802_v20 }
  0x4d   :  { %1182 = vmatprep.subr.bf16.mxu1 %v1260_v24  ;;  %1167 = vmatpush3.bf16.msra.mxu0 %v1280_v40  ;;  %v1290_v24 = vld [vmem:[#allocation7 + $0x140] sm:$0xff]   ;;  %v1308_v40 = vld [vmem:[#allocation7 + $0x128] sm:$0xff]  }
  0x4e   :  { %1168 = vmatprep.subr.bf16.mxu0 %v1282_v42  ;;  %v1310_v42 = vld [vmem:[#allocation7 + $0x170] sm:$0xff]  }
  0x50   :  { %1183 = vmatpush3.bf16.msra.mxu1 %v1261_v25  ;;  %v1291_v25 = vld [vmem:[#allocation7 + $0x100] sm:$0xff]  }
  0x51   :  { %1184 = vmatprep.subr.bf16.mxu1 %v1263_v26  ;;  %1169 = vmatpush3.bf16.msra.mxu0 %v1284_v44  ;;  %v1292_v26 = vld [vmem:[#allocation7 + $0x148] sm:$0xff]   ;;  %v1312_v44 = vld [vmem:[#allocation7 + $0x130] sm:$0xff]  }
  0x52   :  { %1170 = vmatprep.subr.bf16.mxu0 %v1286_v46  ;;  %v1314_v46 = vld [vmem:[#allocation7 + $0x178] sm:$0xff]  }
  0x54   :  { %1185 = vmatpush3.bf16.msra.mxu1 %v1265_v27  ;;  %v1293_v27 = vld [vmem:[#allocation7 + $0x108] sm:$0xff]  }
  0x55   :  { %1186 = vmatprep.subr.bf16.mxu1 %v1267_v28  ;;  %1171 = vmatpush3.bf16.msra.mxu0 %v1287_v47  ;;  %v1294_v28 = vld [vmem:[#allocation7 + $0x150] sm:$0xff]   ;;  %v1315_v47 = vld [vmem:[#allocation7 + $0x1e8] sm:$0xff]  }
  0x56   :  { %1172 = vmatprep.subr.bf16.mxu0 %v1288_v48  ;;  %v1316_v48 = vld [vmem:[#allocation7 + $0x138] sm:$0xff]  }
  0x58   :  { %1187 = vmatpush3.bf16.msra.mxu1 %v1269_v29  ;;  %v1295_v29 = vld [vmem:[#allocation7 + $0x1c0] sm:$0xff]  }
  0x59   :  { %1188 = vmatprep.subr.bf16.mxu1 %v1271_v31  ;;  %1173 = vmatpush3.bf16.msra.mxu0 %v1289_v49  ;;  %v1297_v31 = vld [vmem:[#allocation7 + $0x180] sm:$0xff]   ;;  %v1317_v49 = vld [vmem:[#allocation7 + $0x1a8] sm:$0xff]  }
  0x5a   :  { %579 = vmatprep.subr.bf16.mxu0 %v1116_v52  ;;  %v1320_v52 = vld [vmem:[#allocation7 + $0x1f8] sm:$0xff]  }
  0x5c   :  { %1189 = vmatpush3.bf16.msra.mxu1 %v1273_v33  ;;  %v1300_v33 = vld [vmem:[#allocation7 + $0x118] sm:$0xff]  }
  0x5d   :  { %1190 = vmatprep.subr.bf16.mxu1 %v1275_v35  ;;  %v1303_v35 = vld [vmem:[#allocation7 + $0x1d0] sm:$0xff]  }
  0x60   :  { %1191 = vmatpush3.bf16.msra.mxu1 %v1277_v37  ;;  %v1305_v37 = vld [vmem:[#allocation7 + $0x190] sm:$0xff]  }
  0x61   :  { %1192 = vmatprep.subr.bf16.mxu1 %v1279_v39  ;;  %v1307_v39 = vld [vmem:[#allocation7 + $0x1d8] sm:$0xff]  }
  0x64   :  { %1193 = vmatpush3.bf16.msra.mxu1 %v1281_v41  ;;  %v1309_v41 = vld [vmem:[#allocation7 + $0x198] sm:$0xff]  }
  0x65   :  { %1194 = vmatprep.subr.bf16.mxu1 %v1283_v43  ;;  %v1311_v43 = vld [vmem:[#allocation7 + $0x1e0] sm:$0xff]  }
  0x68   :  { %1195 = vmatpush3.bf16.msra.mxu1 %v1285_v45  ;;  %v1313_v45 = vld [vmem:[#allocation7 + $0x1a0] sm:$0xff]  }
  0x69   :  { %1202 = vmatprep.subr.bf16.mxu1 %v1290_v24 }
 0x116   :  { %v129_v54 = vpop.f32.mrb[0].mxu1 }
 0x117   :  { %1322 = vtanh.f32 %v129_v54  ;;  %v131_v55 = vpop.f32.mrb[1].mxu1 }
 0x118   :  { %1324 = vtanh.f32 %v131_v55  ;;  %v133_v56 = vpop.f32.mrb[2].mxu1 }
 0x119   :  { %1326 = vtanh.f32 %v133_v56  ;;  %v135_v57 = vpop.f32.mrb[3].mxu1 }
 0x11a   :  { %1328 = vtanh.f32 %v135_v57 }
 0x11e   :  { %v234_v58 = vpop.f32.mrb[4].mxu1 }
 0x11f   :  { %1330 = vtanh.f32 %v234_v58  ;;  %v236_v59 = vpop.f32.mrb[5].mxu1 }
 0x120   :  { %1332 = vtanh.f32 %v236_v59  ;;  %v238_v60 = vpop.f32.mrb[6].mxu1 }
 0x121   :  { %v1323_v61 = vpop.eup %1322  ;;  %1334 = vtanh.f32 %v238_v60  ;;  %v240_v62 = vpop.f32.mrb[7].mxu1 }
 0x122   :  { %v1325_v63 = vpop.eup %1324  ;;  %1336 = vtanh.f32 %v240_v62 }
 0x123   :  { %v1327_v1 = vpop.eup %1326 }
 0x124   :  { %v1329_v2 = vpop.eup %1328  ;;  %v142_v3 = vpack.c.bf16 %v1327_v1, %v1323_v61 }
 0x125   :  { %v143_v4 = vpack.c.bf16 %v1329_v2, %v1325_v63 }
 0x127   :  { %546 = vmatprep.mubr.bf16.mxu1 %v143_v4 }
 0x128   :  { %547 = vmatmul.mubr.bf16.vlgmr.msra.gmra.mrb[8].mxu1 %v142_v3 }
 0x129   :  { %v1331_v5 = vpop.eup %1330  ;;  %1203 = vmatpush3.bf16.msra.mxu1 %v1291_v25 }
 0x12a   :  { %v1333_v6 = vpop.eup %1332  ;;  %1204 = vmatprep.subr.bf16.mxu1 %v1292_v26 }
 0x12b   :  { %v1335_v7 = vpop.eup %1334 }
 0x12c   :  { %v1337_v10 = vpop.eup %1336  ;;  %v247_v11 = vpack.c.bf16 %v1335_v7, %v1331_v5 }
 0x12d   :  { %v248_v12 = vpack.c.bf16 %v1337_v10, %v1333_v6  ;;  %1205 = vmatpush3.bf16.msra.mxu1 %v1293_v27 }
 0x12e   :  { %1206 = vmatprep.subr.bf16.mxu1 %v1294_v28 }
 0x12f   :  { %409 = vmatprep.mubr.bf16.mxu0 %v248_v12 }
 0x130   :  { %410 = vmatmul.mubr.bf16.vlgmr.msra.gmra.mrb[0].mxu0 %v247_v11 }
 0x131   :  { %580 = vmatpush1.bf16.msra.mxu0 %v1115_v53  ;;  %611 = vmatprep.mubr.bf16.mxu0 %v1455_v0  ;;  %v1321_v53 = vld [vmem:[#allocation7 + $0x1b8] sm:$0xff]  }
 0x132   :  { %581 = vmatprep.subr.bf16.mxu0 %v1118_v13  ;;  %1207 = vmatpush3.bf16.msra.mxu1 %v1296_v30 }
 0x135   :  { %582 = vmatpush1.bf16.msra.mxu0 %v1117_v17 }
 0x136   :  { %823 = vmatprep.subr.bf16.mxu0 %v1137_v18 }
 0x138   :  { %1119 = vmatmul.mubr.msk.bf16.vlgmr.msra.gmra.mrb[4].mxu0 %vm91_vm0, %v1521_v14 }
 0x139   :  { %824 = vmatpush1.bf16.msra.mxu0 %v1136_v21  ;;  %855 = vmatprep.mubr.bf16.mxu0 %v1455_v0  ;;  %v1298_v0 = vld [vmem:[#allocation7 + $0x158] sm:$0xff]  }
 0x13a   :  { %825 = vmatprep.subr.bf16.mxu0 %v1139_v22  ;;  %1208 = vmatprep.subr.bf16.mxu1 %v1298_v0 }
 0x13b   :  { %1209 = vmatpush3.bf16.msra.mxu1 %v1300_v33 }
 0x13c   :  { %1210 = vmatprep.subr.bf16.mxu1 %v1302_v34 }
 0x13d   :  { %826 = vmatpush1.bf16.msra.mxu0 %v1138_v23 }
 0x13e   :  { %1224 = vmatprep.subr.bf16.mxu0 %v1295_v29 }
 0x13f   :  { %1211 = vmatpush3.bf16.msra.mxu1 %v1304_v36  ;;  %v1157_v36 = vld [vmem:[%s1552_s3] ss:$0 sm:$0xff] }
 0x140   :  { %1140 = vmatmul.mubr.msk.bf16.vlgmr.msra.gmra.mrb[8].mxu0 %vm91_vm0, %v1521_v14  ;;  %v1301_v14 = vld [vmem:[#allocation7 + $0x188] sm:$0xff]   ;;  %1212 = vmatprep.subr.bf16.mxu1 %v1306_v38 }
 0x141   :  { %1225 = vmatpush3.bf16.msra.mxu0 %v1297_v31 }
 0x142   :  { %1226 = vmatprep.subr.bf16.mxu0 %v1299_v32 }
 0x143   :  { %1213 = vmatpush3.bf16.msra.mxu1 %v1308_v40 }
 0x144   :  { %1214 = vmatprep.subr.bf16.mxu1 %v1310_v42 }
 0x145   :  { %1227 = vmatpush3.bf16.msra.mxu0 %v1301_v14 }
 0x146   :  { %1228 = vmatprep.subr.bf16.mxu0 %v1303_v35 }
 0x147   :  { %1215 = vmatpush3.bf16.msra.mxu1 %v1312_v44 }
 0x148   :  { %1216 = vmatprep.subr.bf16.mxu1 %v1314_v46 }
 0x149   :  { %1229 = vmatpush3.bf16.msra.mxu0 %v1305_v37 }
 0x14a   :  { %1230 = vmatprep.subr.bf16.mxu0 %v1307_v39 }
 0x14b   :  { %1217 = vmatpush3.bf16.msra.mxu1 %v1316_v48 }
 0x14d   :  { %1231 = vmatpush3.bf16.msra.mxu0 %v1309_v41 }
 0x14e   :  { %1232 = vmatprep.subr.bf16.mxu0 %v1311_v43 }
 0x151   :  { %1233 = vmatpush3.bf16.msra.mxu0 %v1313_v45 }
 0x152   :  { %1234 = vmatprep.subr.bf16.mxu0 %v1315_v47 }
 0x155   :  { %1235 = vmatpush3.bf16.msra.mxu0 %v1317_v49 }
 0x156   :  { %1236 = vmatprep.subr.bf16.mxu0 %v1318_v50 }
 0x159   :  { %1237 = vmatpush3.bf16.msra.mxu0 %v1319_v51 }
 0x15a   :  { %1238 = vmatprep.subr.bf16.mxu0 %v1320_v52 }
 0x15d   :  { %1239 = vmatpush3.bf16.msra.mxu0 %v1321_v53 }
 0x1fb   :  { %v1196_v54 = vpop.f32.mrb[8].mxu1 }
 0x1fc   :  { %v1197_v55 = vpop.f32.mrb[9].mxu1 }
 0x1fd   :  { %v1198_v56 = vadd.f32 %v1197_v55, %v1196_v54  ;;  %v1199_v57 = vpop.f32.mrb[10].mxu1 }
 0x1fe   :  { %v1200_v58 = vpop.f32.mrb[11].mxu1 }
 0x1ff   :  { %v1201_v59 = vadd.f32 %v1200_v58, %v1199_v57 }
 0x203   :  { %v1174_v60 = vpop.f32.mrb[0].mxu0 }
 0x204   :  { %v1175_v61 = vpop.f32.mrb[1].mxu0 }
 0x205   :  { %v1176_v62 = vadd.f32 %v1175_v61, %v1174_v60  ;;  %v1177_v63 = vpop.f32.mrb[2].mxu0 }
 0x206   :  { %v1178_v1 = vpop.f32.mrb[3].mxu0 }
 0x207   :  { %v549_v2 = vadd.f32 %v1198_v56, %v1176_v62  ;;  %v1179_v3 = vadd.f32 %v1178_v1, %v1177_v63 }
 0x209   :  { %v552_v4 = vadd.f32 %v1201_v59, %v1179_v3 }
 0x20b   :  { %v613_v5 = vpop.f32.mrb[4].mxu0 }
 0x20c   :  { %1338 = vtanh.f32 %v613_v5  ;;  %v615_v6 = vpop.f32.mrb[5].mxu0 }
 0x20d   :  { %1340 = vtanh.f32 %v615_v6  ;;  %v617_v7 = vpop.f32.mrb[6].mxu0 }
 0x20e   :  { %1342 = vtanh.f32 %v617_v7  ;;  %v619_v8 = vpop.f32.mrb[7].mxu0 }
 0x20f   :  { %1344 = vtanh.f32 %v619_v8 }
 0x213   :  { %v857_v9 = vpop.f32.mrb[8].mxu0 }
 0x214   :  { %1346 = vtanh.f32 %v857_v9  ;;  %v859_v10 = vpop.f32.mrb[9].mxu0 }
 0x215   :  { %1348 = vtanh.f32 %v859_v10  ;;  %v861_v11 = vpop.f32.mrb[10].mxu0 }
 0x216   :  { %v1339_v12 = vpop.eup %1338  ;;  %1350 = vtanh.f32 %v861_v11  ;;  %v863_v13 = vpop.f32.mrb[11].mxu0 }
 0x217   :  { %v1341_v15 = vpop.eup %1340  ;;  %1352 = vtanh.f32 %v863_v13 }
 0x218   :  { %v1343_v16 = vpop.eup %1342 }
 0x219   :  { %v1345_v17 = vpop.eup %1344  ;;  %v626_v18 = vpack.c.bf16 %v1343_v16, %v1339_v12 }
 0x21a   :  { %v627_v19 = vpack.c.bf16 %v1345_v17, %v1341_v15 }
 0x21c   :  { %788 = vmatprep.mubr.bf16.mxu1 %v627_v19 }
 0x21d   :  { %789 = vmatmul.mubr.bf16.vlgmr.msra.gmra.mrb[12].mxu1 %v626_v18 }
 0x21e   :  { %v1347_v20 = vpop.eup %1346 }
 0x21f   :  { %v1349_v21 = vpop.eup %1348 }
 0x220   :  { %v1351_v22 = vpop.eup %1350 }
 0x221   :  { %v1353_v23 = vpop.eup %1352  ;;  %v870_v24 = vpack.c.bf16 %v1351_v22, %v1347_v20 }
 0x222   :  { %v871_v25 = vpack.c.bf16 %v1353_v23, %v1349_v21 }
 0x224   :  { %1032 = vmatprep.mubr.bf16.mxu0 %v871_v25 }
 0x225   :  { %1033 = vmatmul.mubr.bf16.vlgmr.msra.gmra.mrb[12].mxu0 %v870_v24 }
 0x2f0   :  { %v1218_v26 = vpop.f32.mrb[12].mxu1 }
 0x2f1   :  { %v1219_v27 = vpop.f32.mrb[13].mxu1 }
 0x2f2   :  { %v1220_v28 = vadd.f32 %v1219_v27, %v1218_v26  ;;  %v1221_v29 = vpop.f32.mrb[14].mxu1 }
 0x2f3   :  { %v1222_v30 = vpop.f32.mrb[15].mxu1 }
 0x2f4   :  { %v797_v31 = vadd.f32 %v1220_v28, %v549_v2  ;;  %v1223_v0 = vadd.f32 %v1222_v30, %v1221_v29 }
 0x2f6   :  { %v798_v32 = vadd.f32 %v1223_v0, %v552_v4 }
 0x2f8   :  { %v1240_v33 = vpop.f32.mrb[12].mxu0 }
 0x2f9   :  { %v1241_v14 = vpop.f32.mrb[13].mxu0 }
 0x2fa   :  { %v1242_v34 = vadd.f32 %v1241_v14, %v1240_v33  ;;  %v1243_v35 = vpop.f32.mrb[14].mxu0 }
 0x2fb   :  { %v1244_v37 = vpop.f32.mrb[15].mxu0 }
 0x2fc   :  { %v1041_v38 = vadd.f32 %v1242_v34, %v797_v31  ;;  %v1245_v39 = vadd.f32 %v1244_v37, %v1243_v35 }
 0x2fe   :  { %v1050_v40 = vadd.f32 %v1157_v36, %v1041_v38  ;;  %v1042_v41 = vadd.f32 %v1245_v39, %v798_v32 }
 0x300   :  { %1052 = vst [vmem:[#allocation8] sm:$0xff] %v1050_v40  ;;  %v1051_v42 = vadd.f32 %v1157_v36, %v1042_v41 }
 0x302   :  { %1053 = vst [vmem:[#allocation8 + $0x8] sm:$0xff] %v1051_v42 }
 0x303   :  { %1431 = shalt.err (!%p1428_p0)
}
 0x304   :  { %s1432_s6 = scalar_lea.hbm %s1553_s4, 256 }
 0x305   :  { %p1433_p1 = scmp.ne.s32.totalorder %s1553_s4, %s1432_s6  ;;  %p1436_p2 = scmp.lt.u32.totalorder %s1432_s6, %s1553_s4 }
 0x307   :  { %p1438_p3 = pnand %p1436_p2, %p1433_p1 }
 0x309   :  { %1441 = shalt.err (!%p1438_p3)
}
 0x30a   :  { %s1457_s11 = smov 128   ;;  %s1458_s12 = smov 8  }
 0x30b   :  { %1065 = dma.vmem_to_hbm [thread:$0]  %s1060_s29, 256, %s1553_s4, [#allocation4], %s1457_s11, %s1457_s11, %s1458_s12  }
 0x30c   :  { %1446 = dma.done.wait [#allocation4], 256  }
 0x30d   :  { %1447 = vsyncadd [#allocation4], 4294967040 }
 0x30e   :  { %1069 = vsyncpa [#allocation3], 1 }
 0x30f   :  { %1070 = vsyncpa [#allocation6], 1 }
 0x310   :  { %1071 = vsyncpa [#allocation4], 1 }

</bundles_post_ra>
